<compile_context>
chip_gen: v7x
topology: tpu7x:2x2x1
jax: 0.10.0
libtpu: 0.0.40
codegen_flags: <defaults>
</compile_context>

<pallas_src>
import functools
import math

import jax
import jax.numpy as jnp
from jax.experimental import pallas as pl
from jax.experimental.pallas import tpu as pltpu

N_CLASSES = 10
REP_SIZE = 64            # embed_size of the Gaussian mixture == rep_size
HIDDEN = 256             # MLP hidden width (fixed in the PyTorch module)
BN_EPS = 1e-5
LOG_SIGMA_BOUND = math.log(0.02)
LOG_2PI = math.log(2.0 * math.pi)

C_PAD = 128              # lane-dense padded class axis (sliced back to N_CLASSES)
TILE_N_MAX = 512         # batch tile; safe on v5e/v6e/v7x (cap ~1024 on v7x's 64 MiB VMEM)
VMEM_LIMIT_BYTES = 32 * 1024 * 1024


def _round_up(x, m):
    return (x + m - 1) // m * m


# ---------------------------------------------------------------------------
# Pass 1: fused (disc_classifier ∘ Linear(nC,256)) matmul + BN partial sums
# ---------------------------------------------------------------------------
def _fused_linear_stats_kernel(x_ref, wf_ref, bf_ref, h_ref, stats_ref, *, n_rows):
    tile_n = x_ref.shape[0]
    i = pl.program_id(0)

    # bf16 x bf16 -> f32 accumulate on the MXU
    h = jnp.dot(x_ref[...], wf_ref[...], preferred_element_type=jnp.float32) + bf_ref[...]
    h_ref[...] = h

    # Mask batch-padding rows so the BatchNorm statistics stay exact.
    row = jax.lax.broadcasted_iota(jnp.int32, (tile_n, 1), 0) + i * tile_n
    hm = jnp.where(row < n_rows, h, 0.0)
    s1 = jnp.sum(hm, axis=0, keepdims=True)          # (1, HIDDEN)  sum(h)
    s2 = jnp.sum(hm * hm, axis=0, keepdims=True)     # (1, HIDDEN)  sum(h^2)

    # Per-tile stats packed into an (8, HIDDEN) block: row 0 = sum, row 1 = sumsq.
    sub = jax.lax.broadcasted_iota(jnp.int32, (8, 1), 0)
    stats_ref[...] = jnp.where(sub == 0, s1, 0.0) + jnp.where(sub == 1, s2, 0.0)


# ---------------------------------------------------------------------------
# Pass 2: BatchNorm apply + ReLU + Linear(256, rep) + Gaussian-mixture log-lik
# ---------------------------------------------------------------------------
def _bn_mlp_gmm_kernel(h_ref, bnsc_ref, bnsh_ref, w2_ref, b2_ref,
                       a_ref, b_ref, c_ref, ll_ref):
    # BN (training-mode batch stats, identity affine) folded into scale/shift + ReLU
    h = jnp.maximum(h_ref[...] * bnsc_ref[...] + bnsh_ref[...], 0.0)
    # Linear(256, rep_size)
    rep = jnp.dot(h.astype(jnp.bfloat16), w2_ref[...],
                  preferred_element_type=jnp.float32) + b2_ref[...]
    # ll = const + rep @ A + (rep*rep) @ B   (all scaling pre-folded in the wrapper)
    ll_ref[...] = (c_ref[...]
                   + jnp.dot(rep, a_ref[...], preferred_element_type=jnp.float32)
                   + jnp.dot(rep * rep, b_ref[...], preferred_element_type=jnp.float32))


# ---------------------------------------------------------------------------
# Wrapper
# ---------------------------------------------------------------------------
def sdim_forward(x_nchw, params, *, tile_n=TILE_N_MAX):
    n = x_nchw.shape[0]
    x_flat = x_nchw.reshape(n, -1).astype(jnp.float32)
    d_in = x_flat.shape[1]

    # ---- parameter-only preprocessing (hoisted out of the kernels) ----
    wf = (params["wc"] @ params["w1"]).astype(jnp.bfloat16)            # (D_in, 256)
    bf = (params["bc"] @ params["w1"] + params["b1"]).astype(jnp.float32)  # (1, 256)
    w2 = params["w2"].astype(jnp.bfloat16)                             # (256, 64)
    b2 = params["b2"].astype(jnp.float32)                              # (1, 64)

    # GMM constants:  ll = s*[ Σ_e(log2π + 2ls + m² iv) - 2 rep·(m iv) + rep²·iv ], s=-0.5/E
    scale = -0.5 / float(REP_SIZE)
    ls = jnp.maximum(params["log_sigma"].astype(jnp.float32), LOG_SIGMA_BOUND)   # (C, E)
    iv = jnp.exp(-2.0 * ls)
    mean = params["mean"].astype(jnp.float32)
    a_mat = (-2.0 * scale) * (mean * iv).T                             # (E, C)
    b_mat = scale * iv.T                                               # (E, C)
    c_row = scale * jnp.sum(LOG_2PI + 2.0 * ls + mean * mean * iv, axis=-1)      # (C,)
    a_pad = jnp.zeros((REP_SIZE, C_PAD), jnp.float32).at[:, :N_CLASSES].set(a_mat)
    b_pad = jnp.zeros((REP_SIZE, C_PAD), jnp.float32).at[:, :N_CLASSES].set(b_mat)
    c_pad = jnp.zeros((1, C_PAD), jnp.float32).at[0, :N_CLASSES].set(c_row)

    # ---- batch tiling ----
    tile = min(tile_n, _round_up(n, 8))
    n_pad = _round_up(n, tile)
    nb = n_pad // tile
    x_p = jnp.zeros((n_pad, d_in), jnp.float32).at[:n].set(x_flat).astype(jnp.bfloat16)

    cparams = pltpu.CompilerParams(dimension_semantics=("parallel",),
                                   vmem_limit_bytes=VMEM_LIMIT_BYTES)

    # ---- pass 1: fused linear + per-tile BN partial sums ----
    h, stats = pl.pallas_call(
        functools.partial(_fused_linear_stats_kernel, n_rows=n),
        out_shape=(jax.ShapeDtypeStruct((n_pad, HIDDEN), jnp.float32),
                   jax.ShapeDtypeStruct((nb * 8, HIDDEN), jnp.float32)),
        grid=(nb,),
        in_specs=[pl.BlockSpec((tile, d_in), lambda i: (i, 0)),
                  pl.BlockSpec((d_in, HIDDEN), lambda i: (0, 0)),
                  pl.BlockSpec((1, HIDDEN), lambda i: (0, 0))],
        out_specs=(pl.BlockSpec((tile, HIDDEN), lambda i: (i, 0)),
                   pl.BlockSpec((8, HIDDEN), lambda i: (i, 0))),
        compiler_params=cparams,
    )(x_p, wf, bf)

    # ---- exact full-batch BN statistics from per-tile partial sums (tiny, plain JAX) ----
    stats = stats.reshape(nb, 8, HIDDEN)
    s1 = jnp.sum(stats[:, 0, :], axis=0)
    s2 = jnp.sum(stats[:, 1, :], axis=0)
    mu = s1 / n
    var = s2 / n - mu * mu                     # biased variance (training-mode BN)
    rstd = jax.lax.rsqrt(var + BN_EPS)
    bn_scale = rstd[None, :]
    bn_shift = (-mu * rstd)[None, :]

    # ---- pass 2: BN apply + ReLU + Linear(256, rep) + GMM log-lik ----
    ll_pad = pl.pallas_call(
        _bn_mlp_gmm_kernel,
        out_shape=jax.ShapeDtypeStruct((n_pad, C_PAD), jnp.float32),
        grid=(nb,),
        in_specs=[pl.BlockSpec((tile, HIDDEN), lambda i: (i, 0)),
                  pl.BlockSpec((1, HIDDEN), lambda i: (0, 0)),
                  pl.BlockSpec((1, HIDDEN), lambda i: (0, 0)),
                  pl.BlockSpec((HIDDEN, REP_SIZE), lambda i: (0, 0)),
                  pl.BlockSpec((1, REP_SIZE), lambda i: (0, 0)),
                  pl.BlockSpec((REP_SIZE, C_PAD), lambda i: (0, 0)),
                  pl.BlockSpec((REP_SIZE, C_PAD), lambda i: (0, 0)),
                  pl.BlockSpec((1, C_PAD), lambda i: (0, 0))],
        out_specs=pl.BlockSpec((tile, C_PAD), lambda i: (i, 0)),
        compiler_params=cparams,
    )(h, bn_scale, bn_shift, w2, b2, a_pad, b_pad, c_pad)

    return ll_pad[:n, :N_CLASSES]


# ---------------------------------------------------------------------------
# Pure-JAX f32 reference with the original (unfused, broadcast-GMM) structure.
# ---------------------------------------------------------------------------
def _reference(x_flat, p):
    hp = jax.lax.Precision.HIGHEST
    logits = jnp.dot(x_flat, p["wc"], precision=hp) + p["bc"]
    h = jnp.dot(logits, p["w1"], precision=hp) + p["b1"]
    mu = h.mean(0, keepdims=True)
    var = ((h - mu) ** 2).mean(0, keepdims=True)
    h = jnp.maximum((h - mu) * jax.lax.rsqrt(var + BN_EPS), 0.0)
    rep = jnp.dot(h, p["w2"], precision=hp) + p["b2"]
    ls = jnp.maximum(p["log_sigma"], LOG_SIGMA_BOUND)
    diff = rep[:, None, :] - p["mean"][None, :, :]
    tmp = LOG_2PI + 2.0 * ls[None] + diff * diff * jnp.exp(-2.0 * ls)[None]
    return -0.5 * tmp.sum(-1) / REP_SIZE


if __name__ == "__main__":
    key = jax.random.PRNGKey(0)
    kx, kwc, kbc, kw1, kb1, kw2, kb2, kemb = jax.random.split(key, 8)

    N, C, H, W = 4, 4, 16, 16
    D_in = C * H * W
    x = jax.random.normal(kx, (N, C, H, W), jnp.float32)

    params = {
        # synthesized disc_classifier: Linear(D_in, n_classes)
        "wc": jax.random.normal(kwc, (D_in, N_CLASSES), jnp.float32) / math.sqrt(D_in),
        "bc": jax.random.normal(kbc, (1, N_CLASSES), jnp.float32) * 0.01,
        # MLP: Linear(n_classes, 256), Linear(256, rep_size); BN affine = identity at init
        "w1": jax.random.normal(kw1, (N_CLASSES, HIDDEN), jnp.float32) / math.sqrt(N_CLASSES),
        "b1": jax.random.normal(kb1, (1, HIDDEN), jnp.float32) * 0.01,
        "w2": jax.random.normal(kw2, (HIDDEN, REP_SIZE), jnp.float32) / math.sqrt(HIDDEN),
        "b2": jax.random.normal(kb2, (1, REP_SIZE), jnp.float32) * 0.01,
    }
    # class_embed: nn.Embedding(n_classes, 2*embed_size) ~ N(0,1), split into mean / log_sigma
    emb = jax.random.normal(kemb, (N_CLASSES, 2 * REP_SIZE), jnp.float32)
    params["mean"] = emb[:, :REP_SIZE]
    params["log_sigma"] = emb[:, REP_SIZE:]

    out = sdim_forward(x, params)
    jax.block_until_ready(out)

    ref = _reference(x.reshape(N, -1), params)
    assert out.shape == (N, N_CLASSES)
    max_err = jnp.max(jnp.abs(out - ref))
    # Loose tolerance accounts for the deliberate bf16 MXU inputs (f32 accumulate).
    assert jnp.allclose(out, ref, atol=5e-2, rtol=5e-2), (max_err, out, ref)

    print("KERNEL_OK")
</pallas_src>

<mosaic_0001>
module attributes {stable_mosaic.version = 11 : i64} {
  func.func @_fused_linear_stats_kernel(%arg0: i32, %arg1: memref<8x1024xbf16, #tpu.memory_space<vmem>>, %arg2: memref<1024x256xbf16, #tpu.memory_space<vmem>>, %arg3: memref<1x256xf32, #tpu.memory_space<vmem>>, %arg4: memref<8x256xf32, #tpu.memory_space<vmem>>, %arg5: memref<8x256xf32, #tpu.memory_space<vmem>>) attributes {dimension_semantics = [#tpu.dimension_semantics<parallel>], iteration_bounds = array<i64: 1>, scalar_prefetch = 0 : i64, scratch_operands = 0 : i64, tpu.core_type = #tpu.core_type<tc>, window_params = [{transform_indices = @transform_0, window_bounds = array<i64: 8, 1024>}, {pipeline_mode = #tpu.pipeline_mode<synchronous>, transform_indices = @transform_1, window_bounds = array<i64: 1024, 256>}, {pipeline_mode = #tpu.pipeline_mode<synchronous>, transform_indices = @transform_2, window_bounds = array<i64: 1, 256>}, {transform_indices = @transform_3, window_bounds = array<i64: 8, 256>}, {transform_indices = @transform_4, window_bounds = array<i64: 8, 256>}]} {
    %c0 = arith.constant 0 : index
    %c0_0 = arith.constant 0 : index
    %0 = vector.load %arg1[%c0, %c0_0] : memref<8x1024xbf16, #tpu.memory_space<vmem>>, vector<8x1024xbf16>
    %c0_1 = arith.constant 0 : index
    %c0_2 = arith.constant 0 : index
    %1 = vector.load %arg2[%c0_1, %c0_2] : memref<1024x256xbf16, #tpu.memory_space<vmem>>, vector<1024x256xbf16>
    %cst = arith.constant dense<0.000000e+00> : vector<8x256xf32>
    %2 = tpu.matmul %0, %1, %cst {dimension_numbers = #tpu.dot_dimension_numbers<[1], [0], [0], [1], [0, 0, 1, 1], [], []>} : vector<8x1024xbf16>, vector<1024x256xbf16>, vector<8x256xf32> -> vector<8x256xf32>
    %c0_3 = arith.constant 0 : index
    %c0_4 = arith.constant 0 : index
    %3 = vector.load %arg3[%c0_3, %c0_4] : memref<1x256xf32, #tpu.memory_space<vmem>>, vector<1x256xf32>
    %4 = vector.broadcast %3 : vector<1x256xf32> to vector<8x256xf32>
    %5 = arith.addf %2, %4 : vector<8x256xf32>
    %c0_5 = arith.constant 0 : index
    %c0_6 = arith.constant 0 : index
    %6 = vector.load %arg4[%c0_5, %c0_6] : memref<8x256xf32, #tpu.memory_space<vmem>>, vector<8x256xf32>
    tpu.vector_store %arg4[%c0_5, %c0_6], %5 {strides = array<i32>} : memref<8x256xf32, #tpu.memory_space<vmem>>, vector<8x256xf32>,
    %7 = tpu.iota {dimensions = array<i32: 0>} : vector<8x1xi32>
    %c8_i32 = arith.constant 8 : i32
    %8 = arith.muli %arg0, %c8_i32 : i32
    %9 = vector.broadcast %8 : i32 to vector<8x1xi32>
    %10 = arith.addi %7, %9 : vector<8x1xi32>
    %c4_i32 = arith.constant 4 : i32
    %11 = vector.broadcast %c4_i32 : i32 to vector<8x1xi32>
    %12 = arith.cmpi slt, %10, %11 : vector<8x1xi32>
    %cst_7 = arith.constant 0.000000e+00 : f32
    %13 = vector.shape_cast %12 : vector<8x1xi1> to vector<8x1xi1>
    %14 = vector.broadcast %13 : vector<8x1xi1> to vector<8x256xi1>
    %15 = vector.broadcast %cst_7 : f32 to vector<8x256xf32>
    %16 = arith.select %14, %5, %15 : vector<8x256xi1>, vector<8x256xf32>
    %cst_8 = arith.constant dense<0.000000e+00> : vector<256xf32>
    %17 = vector.multi_reduction <add>, %16, %cst_8 [0] : vector<8x256xf32> to vector<256xf32>
    %18 = vector.shape_cast %17 : vector<256xf32> to vector<1x256xf32>
    %19 = arith.mulf %16, %16 : vector<8x256xf32>
    %cst_9 = arith.constant dense<0.000000e+00> : vector<256xf32>
    %20 = vector.multi_reduction <add>, %19, %cst_9 [0] : vector<8x256xf32> to vector<256xf32>
    %21 = vector.shape_cast %20 : vector<256xf32> to vector<1x256xf32>
    %22 = tpu.iota {dimensions = array<i32: 0>} : vector<8x1xi32>
    %c0_i32 = arith.constant 0 : i32
    %23 = vector.broadcast %c0_i32 : i32 to vector<8x1xi32>
    %24 = arith.cmpi eq, %22, %23 : vector<8x1xi32>
    %cst_10 = arith.constant 0.000000e+00 : f32
    %25 = vector.shape_cast %24 : vector<8x1xi1> to vector<8x1xi1>
    %26 = vector.broadcast %25 : vector<8x1xi1> to vector<8x256xi1>
    %27 = vector.shape_cast %18 : vector<1x256xf32> to vector<1x256xf32>
    %28 = vector.broadcast %27 : vector<1x256xf32> to vector<8x256xf32>
    %29 = vector.broadcast %cst_10 : f32 to vector<8x256xf32>
    %30 = arith.select %26, %28, %29 : vector<8x256xi1>, vector<8x256xf32>
    %c1_i32 = arith.constant 1 : i32
    %31 = vector.broadcast %c1_i32 : i32 to vector<8x1xi32>
    %32 = arith.cmpi eq, %22, %31 : vector<8x1xi32>
    %cst_11 = arith.constant 0.000000e+00 : f32
    %33 = vector.shape_cast %32 : vector<8x1xi1> to vector<8x1xi1>
    %34 = vector.broadcast %33 : vector<8x1xi1> to vector<8x256xi1>
    %35 = vector.shape_cast %21 : vector<1x256xf32> to vector<1x256xf32>
    %36 = vector.broadcast %35 : vector<1x256xf32> to vector<8x256xf32>
    %37 = vector.broadcast %cst_11 : f32 to vector<8x256xf32>
    %38 = arith.select %34, %36, %37 : vector<8x256xi1>, vector<8x256xf32>
    %39 = arith.addf %30, %38 : vector<8x256xf32>
    %c0_12 = arith.constant 0 : index
    %c0_13 = arith.constant 0 : index
    %40 = vector.load %arg5[%c0_12, %c0_13] : memref<8x256xf32, #tpu.memory_space<vmem>>, vector<8x256xf32>
    tpu.vector_store %arg5[%c0_12, %c0_13], %39 {strides = array<i32>} : memref<8x256xf32, #tpu.memory_space<vmem>>, vector<8x256xf32>,
    return
  }
  func.func @transform_0(%arg0: i32) -> (i32, i32) {
    %c0_i32 = arith.constant 0 : i32
    %c0_i32_0 = arith.constant 0 : i32
    return %arg0, %c0_i32 : i32, i32
  }
  func.func @transform_1(%arg0: i32) -> (i32, i32) {
    %c0_i32 = arith.constant 0 : i32
    %c0_i32_0 = arith.constant 0 : i32
    %c0_i32_1 = arith.constant 0 : i32
    return %c0_i32, %c0_i32_0 : i32, i32
  }
  func.func @transform_2(%arg0: i32) -> (i32, i32) {
    %c0_i32 = arith.constant 0 : i32
    %c0_i32_0 = arith.constant 0 : i32
    %c0_i32_1 = arith.constant 0 : i32
    return %c0_i32, %c0_i32_0 : i32, i32
  }
  func.func @transform_3(%arg0: i32) -> (i32, i32) {
    %c0_i32 = arith.constant 0 : i32
    %c0_i32_0 = arith.constant 0 : i32
    return %arg0, %c0_i32 : i32, i32
  }
  func.func @transform_4(%arg0: i32) -> (i32, i32) {
    %c0_i32 = arith.constant 0 : i32
    %c0_i32_0 = arith.constant 0 : i32
    return %arg0, %c0_i32 : i32, i32
  }
}

</mosaic_0001>

<bundles_post_ra>
// kernel: tpu_custom_call.1
= control target key start
LH: loop header
LB: loop body
LE: loop exit
PB: predicated region body
PF: predicated region fallthrough
CT: control target
= control target key end

     0   :  { %10 = vsyncpa [#allocation3], 0  ;;  %s1660_s0 = inlined_call_operand.hbm [shape: bf16[8,1024], index: 0, kind: input, shape index: {}]   ;;  %s1661_s1 = inlined_call_operand.hbm [shape: bf16[1024,256], index: 1, kind: input, shape index: {}]   ;;  %s1662_s2 = inlined_call_operand.vmem [shape: f32[1,256], index: 2, kind: input, shape index: {}]   ;;  %s1663_s3 = inlined_call_operand.hbm [shape: f32[8,256], index: 3, kind: output, shape index: {0}]   ;;  %s1664_s4 = inlined_call_operand.hbm [shape: f32[8,256], index: 4, kind: output, shape index: {1}]  }
   0x1   :  { %11 = vsyncpa [#allocation6], 0 }
   0x2   :  { %12 = vsyncpa [#allocation4], 0 }
   0x3   :  { %13 = vsyncpa [#allocation9], 0  ;;  %s1552_s15 = smov [#allocation2]   ;;  %s1553_s17 = smov [#allocation5]  }
   0x4   :  { %s20_s16 = sshll.u32 %s1552_s15, 4  ;;  %s29_s18 = sshll.u32 %s1553_s17, 4  ;;  %s21_s16 = int_to_ptr.vmem [resolvable:$true] %s20_s16  ;;  %s1583_s18 = int_to_ptr.vmem [resolvable:$true] %s29_s18 }
   0x5   :  { %s1456_s21 = scalar_lea.hbm %s1660_s0, 512 }
   0x6   :  { %p1457_p0 = scmp.ne.s32.totalorder %s1660_s0, %s1456_s21  ;;  %p1460_p1 = scmp.lt.u32.totalorder %s1456_s21, %s1660_s0 }
   0x8   :  { %p1462_p2 = pnand %p1460_p1, %p1457_p0 }
   0xa   :  { %1465 = shalt.err (!%p1462_p2)
}
   0xb   :  { %s1466_s26 = scalar_lea.vmem %s21_s16, 512  ;;  %p1471_p4 = scmp.lt.s32.totalorder %s21_s16, %s21_s16 }
   0xc   :  { %p1467_p3 = scmp.ne.s32.totalorder %s21_s16, %s1466_s26  ;;  %p1472_p5 = scmp.lt.s32.totalorder %s1466_s26, %s1466_s26 }
   0xe   :  { %p1473_p6 = por %p1472_p5, %p1471_p4 }
  0x10   :  { %p1474_p7 = pnand %p1473_p6, %p1467_p3 }
  0x12   :  { %1477 = shalt.err (!%p1474_p7)
}
  0x13   :  { %23 = dma.hbm_to_vmem [thread:$0]  %s1660_s0, 512, %s21_s16, [#allocation3]  }
  0x14   :  { %s1478_s5 = scalar_lea.hbm %s1661_s1, 16384 }
  0x15   :  { %p1479_p8 = scmp.ne.s32.totalorder %s1661_s1, %s1478_s5  ;;  %p1482_p9 = scmp.lt.u32.totalorder %s1478_s5, %s1661_s1 }
  0x17   :  { %p1484_p10 = pnand %p1482_p9, %p1479_p8 }
  0x19   :  { %1487 = shalt.err (!%p1484_p10)
}
  0x1a   :  { %s1488_s10 = scalar_lea.vmem %s1583_s18, 16384  ;;  %p1493_p12 = scmp.lt.s32.totalorder %s1583_s18, %s1583_s18 }
  0x1b   :  { %p1489_p11 = scmp.ne.s32.totalorder %s1583_s18, %s1488_s10  ;;  %p1494_p13 = scmp.lt.s32.totalorder %s1488_s10, %s1488_s10 }
  0x1d   :  { %p1495_p0 = por %p1494_p13, %p1493_p12 }
  0x1f   :  { %p1496_p1 = pnand %p1495_p0, %p1489_p11 }
  0x21   :  { %1499 = shalt.err (!%p1496_p1)
}
  0x22   :  { %s1554_s0 = smov 128   ;;  %s1555_s11 = smov 8  }
  0x23   :  { %35 = dma.hbm_to_vmem [thread:$0]  %s1661_s1, 16384, %s1583_s18, [#allocation6], %s1554_s0, %s1554_s0, %s1555_s11  }
  0x24   :  { %1544 = dma.done.wait [#allocation3], 512  }
  0x25   :  { %1545 = vsyncadd [#allocation3], 4294966784 }
  0x26   :  { %1546 = dma.done.wait [#allocation6], 16384  }
  0x27   :  { %1547 = vsyncadd [#allocation6], 4294950912  ;;  %v1256_v0 = vld [vmem:[#allocation5 + $0x4] ss:$8 sps:$4 sm:$0xff]   ;;  %v1260_v2 = vld [vmem:[#allocation5] ss:$8 sps:$4 sm:$0xff]  }
  0x28   :  { %v1258_v1 = vld [vmem:[#allocation5 + $0x204] ss:$8 sps:$4 sm:$0xff]   ;;  %856 = vmatprep.subr.bf16.mxu1 %v1256_v0  ;;  %v1261_v3 = vld [vmem:[#allocation5 + $0x200] ss:$8 sps:$4 sm:$0xff]   ;;  %v1262_v4 = vld [vmem:[#allocation5 + $0x14] ss:$8 sps:$4 sm:$0xff]  }
  0x29   :  { %938 = vmatprep.subr.bf16.mxu0 %v1258_v1  ;;  %857 = vmatpush1.bf16.msra.mxu1 %v1260_v2  ;;  %v1264_v5 = vld [vmem:[#allocation5 + $0x214] ss:$8 sps:$4 sm:$0xff]   ;;  %v1266_v6 = vld [vmem:[#allocation5 + $0x10] ss:$8 sps:$4 sm:$0xff]   ;;  %v1268_v8 = vld [vmem:[#allocation5 + $0x24] ss:$8 sps:$4 sm:$0xff]  }
  0x2a   :  { %939 = vmatpush1.bf16.msra.mxu0 %v1261_v3  ;;  %858 = vmatprep.subr.bf16.mxu1 %v1262_v4  ;;  %v1267_v7 = vld [vmem:[#allocation5 + $0x210] ss:$8 sps:$4 sm:$0xff]   ;;  %v1270_v9 = vld [vmem:[#allocation5 + $0x224] ss:$8 sps:$4 sm:$0xff]   ;;  %v1272_v10 = vld [vmem:[#allocation5 + $0x20] ss:$8 sps:$4 sm:$0xff]  }
  0x2b   :  { %940 = vmatprep.subr.bf16.mxu0 %v1264_v5  ;;  %v1273_v11 = vld [vmem:[#allocation5 + $0x220] ss:$8 sps:$4 sm:$0xff]   ;;  %v1274_v12 = vld [vmem:[#allocation5 + $0x34] ss:$8 sps:$4 sm:$0xff]   ;;  %v1278_v14 = vld [vmem:[#allocation5 + $0x30] ss:$8 sps:$4 sm:$0xff]  }
  0x2c   :  { %v1276_v13 = vld [vmem:[#allocation5 + $0x234] ss:$8 sps:$4 sm:$0xff]   ;;  %v1279_v15 = vld [vmem:[#allocation5 + $0x230] ss:$8 sps:$4 sm:$0xff]   ;;  %v1280_v16 = vld [vmem:[#allocation5 + $0x44] ss:$8 sps:$4 sm:$0xff]  }
  0x2d   :  { %859 = vmatpush1.bf16.msra.mxu1 %v1266_v6  ;;  %v1282_v17 = vld [vmem:[#allocation5 + $0x244] ss:$8 sps:$4 sm:$0xff]   ;;  %v1284_v18 = vld [vmem:[#allocation5 + $0x40] ss:$8 sps:$4 sm:$0xff]   ;;  %v1286_v20 = vld [vmem:[#allocation5 + $0x54] ss:$8 sps:$4 sm:$0xff]  }
  0x2e   :  { %941 = vmatpush1.bf16.msra.mxu0 %v1267_v7  ;;  %860 = vmatprep.subr.bf16.mxu1 %v1268_v8  ;;  %v1285_v19 = vld [vmem:[#allocation5 + $0x240] ss:$8 sps:$4 sm:$0xff]   ;;  %v1288_v21 = vld [vmem:[#allocation5 + $0x254] ss:$8 sps:$4 sm:$0xff]   ;;  %v1290_v22 = vld [vmem:[#allocation5 + $0x50] ss:$8 sps:$4 sm:$0xff]  }
  0x2f   :  { %942 = vmatprep.subr.bf16.mxu0 %v1270_v9  ;;  %v1291_v23 = vld [vmem:[#allocation5 + $0x250] ss:$8 sps:$4 sm:$0xff]   ;;  %v1292_v24 = vld [vmem:[#allocation5 + $0x64] ss:$8 sps:$4 sm:$0xff]   ;;  %v1296_v26 = vld [vmem:[#allocation5 + $0x60] ss:$8 sps:$4 sm:$0xff]  }
  0x30   :  { %v1294_v25 = vld [vmem:[#allocation5 + $0x264] ss:$8 sps:$4 sm:$0xff]   ;;  %v1297_v27 = vld [vmem:[#allocation5 + $0x260] ss:$8 sps:$4 sm:$0xff]   ;;  %v1298_v28 = vld [vmem:[#allocation5 + $0x74] ss:$8 sps:$4 sm:$0xff]  }
  0x31   :  { %861 = vmatpush1.bf16.msra.mxu1 %v1272_v10  ;;  %v1300_v29 = vld [vmem:[#allocation5 + $0x274] ss:$8 sps:$4 sm:$0xff]   ;;  %v1302_v30 = vld [vmem:[#allocation5 + $0x70] ss:$8 sps:$4 sm:$0xff]   ;;  %v1304_v32 = vld [vmem:[#allocation5 + $0x84] ss:$8 sps:$4 sm:$0xff]  }
  0x32   :  { %943 = vmatpush1.bf16.msra.mxu0 %v1273_v11  ;;  %862 = vmatprep.subr.bf16.mxu1 %v1274_v12  ;;  %v1303_v31 = vld [vmem:[#allocation5 + $0x270] ss:$8 sps:$4 sm:$0xff]   ;;  %v1306_v33 = vld [vmem:[#allocation5 + $0x284] ss:$8 sps:$4 sm:$0xff]   ;;  %v1308_v34 = vld [vmem:[#allocation5 + $0x80] ss:$8 sps:$4 sm:$0xff]  }
  0x33   :  { %944 = vmatprep.subr.bf16.mxu0 %v1276_v13  ;;  %v1309_v35 = vld [vmem:[#allocation5 + $0x280] ss:$8 sps:$4 sm:$0xff]   ;;  %v1310_v36 = vld [vmem:[#allocation5 + $0x94] ss:$8 sps:$4 sm:$0xff]   ;;  %v1314_v38 = vld [vmem:[#allocation5 + $0x90] ss:$8 sps:$4 sm:$0xff]  }
  0x34   :  { %v1312_v37 = vld [vmem:[#allocation5 + $0x294] ss:$8 sps:$4 sm:$0xff]   ;;  %v1315_v39 = vld [vmem:[#allocation5 + $0x290] ss:$8 sps:$4 sm:$0xff]   ;;  %v1316_v40 = vld [vmem:[#allocation5 + $0xa4] ss:$8 sps:$4 sm:$0xff]  }
  0x35   :  { %863 = vmatpush1.bf16.msra.mxu1 %v1278_v14  ;;  %v1318_v41 = vld [vmem:[#allocation5 + $0x2a4] ss:$8 sps:$4 sm:$0xff]   ;;  %v1320_v42 = vld [vmem:[#allocation5 + $0xa0] ss:$8 sps:$4 sm:$0xff]   ;;  %v1322_v44 = vld [vmem:[#allocation5 + $0xb4] ss:$8 sps:$4 sm:$0xff]  }
  0x36   :  { %945 = vmatpush1.bf16.msra.mxu0 %v1279_v15  ;;  %864 = vmatprep.subr.bf16.mxu1 %v1280_v16  ;;  %v1321_v43 = vld [vmem:[#allocation5 + $0x2a0] ss:$8 sps:$4 sm:$0xff]   ;;  %v1324_v45 = vld [vmem:[#allocation5 + $0x2b4] ss:$8 sps:$4 sm:$0xff]   ;;  %v1326_v47 = vld [vmem:[#allocation5 + $0xb0] ss:$8 sps:$4 sm:$0xff]  }
  0x37   :  { %946 = vmatprep.subr.bf16.mxu0 %v1282_v17  ;;  %v44_v46 = vld [vmem:[#allocation2] sm:$0xff]  ;;  %v1327_v49 = vld [vmem:[#allocation5 + $0x2b0] ss:$8 sps:$4 sm:$0xff]   ;;  %v1334_v56 = vld [vmem:[#allocation5 + $0xd4] ss:$8 sps:$4 sm:$0xff]   ;;  %s1556_s15 = smov [#allocation7]  }
  0x38   :  { %v1103_v48 = vcombine.high %v44_v46, %v44_v46  ;;  %v46_v50 = vld [vmem:[#allocation2 + $0x10] sm:$0xff]  ;;  %v1328_v51 = vld [vmem:[#allocation5 + $0xc4] ss:$8 sps:$4 sm:$0xff]   ;;  %v1332_v54 = vld [vmem:[#allocation5 + $0xc0] ss:$8 sps:$4 sm:$0xff]   ;;  %v1102_v6 = vcombine.low %v44_v46, %v44_v46  ;;  %s1078_s16 = sshll.u32 %s1556_s15, 4  ;;  %s1079_s16 = int_to_ptr.vmem [resolvable:$true] %s1078_s16 }
  0x39   :  { %865 = vmatpush1.bf16.msra.mxu1 %v1284_v18  ;;  %v1330_v52 = vld [vmem:[#allocation5 + $0x2c4] ss:$8 sps:$4 sm:$0xff]   ;;  %v1107_v53 = vcombine.high %v46_v50, %v46_v50  ;;  %v1333_v55 = vld [vmem:[#allocation5 + $0x2c0] ss:$8 sps:$4 sm:$0xff]   ;;  %v1336_v57 = vld [vmem:[#allocation5 + $0x2d4] ss:$8 sps:$4 sm:$0xff]   ;;  %v1106_v7 = vcombine.low %v46_v50, %v46_v50  ;;  %p1505_p3 = scmp.lt.s32.totalorder %s1079_s16, %s1079_s16 }
  0x3a   :  { %947 = vmatpush1.bf16.msra.mxu0 %v1285_v19  ;;  %866 = vmatprep.subr.bf16.mxu1 %v1286_v20  ;;  %v1338_v58 = vld [vmem:[#allocation5 + $0xd0] ss:$8 sps:$4 sm:$0xff]   ;;  %v1340_v60 = vld [vmem:[#allocation5 + $0xe4] ss:$8 sps:$4 sm:$0xff]   ;;  %v1344_v62 = vld [vmem:[#allocation5 + $0xe0] ss:$8 sps:$4 sm:$0xff]  }
  0x3b   :  { %948 = vmatprep.subr.bf16.mxu0 %v1288_v21  ;;  %888 = vmatprep.mubr.bf16.mxu1 %v1103_v48  ;;  %v1339_v59 = vld [vmem:[#allocation5 + $0x2d0] ss:$8 sps:$4 sm:$0xff]   ;;  %v1342_v61 = vld [vmem:[#allocation5 + $0x2e4] ss:$8 sps:$4 sm:$0xff]   ;;  %v1345_v63 = vld [vmem:[#allocation5 + $0x2e0] ss:$8 sps:$4 sm:$0xff]  }
  0x3c   :  { %970 = vmatprep.mubr.bf16.mxu0 %v1107_v53  ;;  %v1346_v0 = vld [vmem:[#allocation5 + $0xf4] ss:$8 sps:$4 sm:$0xff]   ;;  %v1350_v2 = vld [vmem:[#allocation5 + $0xf0] ss:$8 sps:$4 sm:$0xff]   ;;  %v1356_v4 = vld [vmem:[#allocation5 + $0x104] ss:$8 sps:$4 sm:$0xff]  }
  0x3d   :  { %867 = vmatpush1.bf16.msra.mxu1 %v1290_v22  ;;  %v1348_v1 = vld [vmem:[#allocation5 + $0x2f4] ss:$8 sps:$4 sm:$0xff]   ;;  %v1351_v3 = vld [vmem:[#allocation5 + $0x2f0] ss:$8 sps:$4 sm:$0xff]   ;;  %v1361_v5 = vld [vmem:[#allocation5 + $0x304] ss:$8 sps:$4 sm:$0xff]  }
  0x3e   :  { %949 = vmatpush1.bf16.msra.mxu0 %v1291_v23  ;;  %868 = vmatprep.subr.bf16.mxu1 %v1292_v24  ;;  %v1354_v8 = vld [vmem:[#allocation5 + $0x100] ss:$8 sps:$4 sm:$0xff]   ;;  %v1364_v10 = vld [vmem:[#allocation5 + $0x114] ss:$8 sps:$4 sm:$0xff]   ;;  %v1362_v12 = vld [vmem:[#allocation5 + $0x110] ss:$8 sps:$4 sm:$0xff]  }
  0x3f   :  { %950 = vmatprep.subr.bf16.mxu0 %v1294_v25  ;;  %v1359_v9 = vld [vmem:[#allocation5 + $0x300] ss:$8 sps:$4 sm:$0xff]   ;;  %v1367_v11 = vld [vmem:[#allocation5 + $0x314] ss:$8 sps:$4 sm:$0xff]   ;;  %v1365_v13 = vld [vmem:[#allocation5 + $0x310] ss:$8 sps:$4 sm:$0xff]  }
  0x40   :  { %v1370_v14 = vld [vmem:[#allocation5 + $0x124] ss:$8 sps:$4 sm:$0xff]   ;;  %v1368_v16 = vld [vmem:[#allocation5 + $0x120] ss:$8 sps:$4 sm:$0xff]   ;;  %v1376_v18 = vld [vmem:[#allocation5 + $0x134] ss:$8 sps:$4 sm:$0xff]  }
  0x41   :  { %869 = vmatpush1.bf16.msra.mxu1 %v1296_v26  ;;  %v1373_v15 = vld [vmem:[#allocation5 + $0x324] ss:$8 sps:$4 sm:$0xff]   ;;  %v1371_v17 = vld [vmem:[#allocation5 + $0x320] ss:$8 sps:$4 sm:$0xff]   ;;  %v1379_v19 = vld [vmem:[#allocation5 + $0x334] ss:$8 sps:$4 sm:$0xff]  }
  0x42   :  { %951 = vmatpush1.bf16.msra.mxu0 %v1297_v27  ;;  %870 = vmatprep.subr.bf16.mxu1 %v1298_v28  ;;  %v1374_v20 = vld [vmem:[#allocation5 + $0x130] ss:$8 sps:$4 sm:$0xff]   ;;  %v1382_v22 = vld [vmem:[#allocation5 + $0x144] ss:$8 sps:$4 sm:$0xff]   ;;  %v1380_v24 = vld [vmem:[#allocation5 + $0x140] ss:$8 sps:$4 sm:$0xff]  }
  0x43   :  { %952 = vmatprep.subr.bf16.mxu0 %v1300_v29  ;;  %v1377_v21 = vld [vmem:[#allocation5 + $0x330] ss:$8 sps:$4 sm:$0xff]   ;;  %v1385_v23 = vld [vmem:[#allocation5 + $0x344] ss:$8 sps:$4 sm:$0xff]   ;;  %v1383_v25 = vld [vmem:[#allocation5 + $0x340] ss:$8 sps:$4 sm:$0xff]  }
  0x44   :  { %v1388_v26 = vld [vmem:[#allocation5 + $0x154] ss:$8 sps:$4 sm:$0xff]   ;;  %v1386_v28 = vld [vmem:[#allocation5 + $0x150] ss:$8 sps:$4 sm:$0xff]   ;;  %v1418_v50 = vld [vmem:[#allocation5 + $0x1a4] ss:$8 sps:$4 sm:$0xff]  }
  0x45   :  { %871 = vmatpush1.bf16.msra.mxu1 %v1302_v30  ;;  %v1391_v27 = vld [vmem:[#allocation5 + $0x354] ss:$8 sps:$4 sm:$0xff]   ;;  %v1389_v29 = vld [vmem:[#allocation5 + $0x350] ss:$8 sps:$4 sm:$0xff]   ;;  %v1394_v30 = vld [vmem:[#allocation5 + $0x164] ss:$8 sps:$4 sm:$0xff]  }
  0x46   :  { %953 = vmatpush1.bf16.msra.mxu0 %v1303_v31  ;;  %872 = vmatprep.subr.bf16.mxu1 %v1304_v32  ;;  %v1397_v31 = vld [vmem:[#allocation5 + $0x364] ss:$8 sps:$4 sm:$0xff]   ;;  %v1412_v46 = vld [vmem:[#allocation5 + $0x194] ss:$8 sps:$4 sm:$0xff]   ;;  %v1410_v48 = vld [vmem:[#allocation5 + $0x190] ss:$8 sps:$4 sm:$0xff]  }
  0x47   :  { %954 = vmatprep.subr.bf16.mxu0 %v1306_v33  ;;  %v1614_v32 = vld [vmem:[#allocation2 + $0x8] sm:$0xff]  ;;  %v1616_v33 = vld [vmem:[#allocation2 + $0x18] sm:$0xff] }
  0x48   :  { %v1419_v53 = vld [vmem:[#allocation5 + $0x3a0] ss:$8 sps:$4 sm:$0xff]  }
  0x49   :  { %873 = vmatpush1.bf16.msra.mxu1 %v1308_v34  ;;  %v1105_v34 = vcombine.high %v1614_v32, %v1614_v32 }
  0x4a   :  { %955 = vmatpush1.bf16.msra.mxu0 %v1309_v35  ;;  %874 = vmatprep.subr.bf16.mxu1 %v1310_v36  ;;  %v1109_v35 = vcombine.high %v1616_v33, %v1616_v33  ;;  %v1392_v36 = vld [vmem:[#allocation5 + $0x160] ss:$8 sps:$4 sm:$0xff]  }
  0x4b   :  { %956 = vmatprep.subr.bf16.mxu0 %v1312_v37  ;;  %v1395_v37 = vld [vmem:[#allocation5 + $0x360] ss:$8 sps:$4 sm:$0xff]  }
  0x4d   :  { %875 = vmatpush1.bf16.msra.mxu1 %v1314_v38  ;;  %v1400_v38 = vld [vmem:[#allocation5 + $0x174] ss:$8 sps:$4 sm:$0xff]  }
  0x4e   :  { %957 = vmatpush1.bf16.msra.mxu0 %v1315_v39  ;;  %876 = vmatprep.subr.bf16.mxu1 %v1316_v40  ;;  %v1403_v39 = vld [vmem:[#allocation5 + $0x374] ss:$8 sps:$4 sm:$0xff]   ;;  %v1398_v40 = vld [vmem:[#allocation5 + $0x170] ss:$8 sps:$4 sm:$0xff]  }
  0x4f   :  { %958 = vmatprep.subr.bf16.mxu0 %v1318_v41  ;;  %v1401_v41 = vld [vmem:[#allocation5 + $0x370] ss:$8 sps:$4 sm:$0xff]  }
  0x51   :  { %877 = vmatpush1.bf16.msra.mxu1 %v1320_v42  ;;  %v1406_v42 = vld [vmem:[#allocation5 + $0x184] ss:$8 sps:$4 sm:$0xff]  }
  0x52   :  { %959 = vmatpush1.bf16.msra.mxu0 %v1321_v43  ;;  %878 = vmatprep.subr.bf16.mxu1 %v1322_v44  ;;  %v1409_v43 = vld [vmem:[#allocation5 + $0x384] ss:$8 sps:$4 sm:$0xff]   ;;  %v1404_v44 = vld [vmem:[#allocation5 + $0x180] ss:$8 sps:$4 sm:$0xff]  }
  0x53   :  { %960 = vmatprep.subr.bf16.mxu0 %v1324_v45  ;;  %v1407_v45 = vld [vmem:[#allocation5 + $0x380] ss:$8 sps:$4 sm:$0xff]  }
  0x55   :  { %879 = vmatpush1.bf16.msra.mxu1 %v1326_v47  ;;  %v1415_v47 = vld [vmem:[#allocation5 + $0x394] ss:$8 sps:$4 sm:$0xff]  }
  0x56   :  { %961 = vmatpush1.bf16.msra.mxu0 %v1327_v49  ;;  %880 = vmatprep.subr.bf16.mxu1 %v1328_v51  ;;  %v1413_v49 = vld [vmem:[#allocation5 + $0x390] ss:$8 sps:$4 sm:$0xff]   ;;  %v1421_v51 = vld [vmem:[#allocation5 + $0x3a4] ss:$8 sps:$4 sm:$0xff]  }
  0x57   :  { %962 = vmatprep.subr.bf16.mxu0 %v1330_v52  ;;  %v1416_v52 = vld [vmem:[#allocation5 + $0x1a0] ss:$8 sps:$4 sm:$0xff]  }
  0x59   :  { %881 = vmatpush1.bf16.msra.mxu1 %v1332_v54  ;;  %v1424_v54 = vld [vmem:[#allocation5 + $0x1b4] ss:$8 sps:$4 sm:$0xff]  }
  0x5a   :  { %963 = vmatpush1.bf16.msra.mxu0 %v1333_v55  ;;  %882 = vmatprep.subr.bf16.mxu1 %v1334_v56  ;;  %v1427_v55 = vld [vmem:[#allocation5 + $0x3b4] ss:$8 sps:$4 sm:$0xff]   ;;  %v1422_v56 = vld [vmem:[#allocation5 + $0x1b0] ss:$8 sps:$4 sm:$0xff]  }
  0x5b   :  { %964 = vmatprep.subr.bf16.mxu0 %v1336_v57  ;;  %v1425_v57 = vld [vmem:[#allocation5 + $0x3b0] ss:$8 sps:$4 sm:$0xff]  }
  0x5d   :  { %883 = vmatpush1.bf16.msra.mxu1 %v1338_v58  ;;  %v1430_v58 = vld [vmem:[#allocation5 + $0x1c4] ss:$8 sps:$4 sm:$0xff]  }
  0x5e   :  { %965 = vmatpush1.bf16.msra.mxu0 %v1339_v59  ;;  %884 = vmatprep.subr.bf16.mxu1 %v1340_v60  ;;  %v1433_v59 = vld [vmem:[#allocation5 + $0x3c4] ss:$8 sps:$4 sm:$0xff]   ;;  %v1428_v60 = vld [vmem:[#allocation5 + $0x1c0] ss:$8 sps:$4 sm:$0xff]  }
  0x5f   :  { %966 = vmatprep.subr.bf16.mxu0 %v1342_v61  ;;  %v1431_v61 = vld [vmem:[#allocation5 + $0x3c0] ss:$8 sps:$4 sm:$0xff]  }
  0x61   :  { %885 = vmatpush1.bf16.msra.mxu1 %v1344_v62  ;;  %v1436_v62 = vld [vmem:[#allocation5 + $0x1d4] ss:$8 sps:$4 sm:$0xff]  }
  0x62   :  { %967 = vmatpush1.bf16.msra.mxu0 %v1345_v63  ;;  %886 = vmatprep.subr.bf16.mxu1 %v1346_v0  ;;  %v1439_v63 = vld [vmem:[#allocation5 + $0x3d4] ss:$8 sps:$4 sm:$0xff]   ;;  %v1434_v0 = vld [vmem:[#allocation5 + $0x1d0] ss:$8 sps:$4 sm:$0xff]  }
  0x63   :  { %968 = vmatprep.subr.bf16.mxu0 %v1348_v1  ;;  %v1437_v1 = vld [vmem:[#allocation5 + $0x3d0] ss:$8 sps:$4 sm:$0xff]  }
  0x65   :  { %887 = vmatpush1.bf16.msra.mxu1 %v1350_v2  ;;  %v1442_v2 = vld [vmem:[#allocation5 + $0x1e4] ss:$8 sps:$4 sm:$0xff]  }
  0x66   :  { %969 = vmatpush1.bf16.msra.mxu0 %v1351_v3  ;;  %897 = vmatprep.subr.bf16.mxu1 %v1356_v4  ;;  %v1445_v3 = vld [vmem:[#allocation5 + $0x3e4] ss:$8 sps:$4 sm:$0xff]   ;;  %v1440_v4 = vld [vmem:[#allocation5 + $0x1e0] ss:$8 sps:$4 sm:$0xff]  }
  0x67   :  { %979 = vmatprep.subr.bf16.mxu0 %v1361_v5  ;;  %v1443_v5 = vld [vmem:[#allocation5 + $0x3e0] ss:$8 sps:$4 sm:$0xff]  }
  0x68   :  { %889 = vmatmul.mubr.bf16.vlgmr.msra.gmra.mrb[0].mxu1 %v1102_v6  ;;  %v1448_v6 = vld [vmem:[#allocation5 + $0x1f4] ss:$8 sps:$4 sm:$0xff]  }
  0x69   :  { %971 = vmatmul.mubr.bf16.vlgmr.msra.gmra.mrb[0].mxu0 %v1106_v7  ;;  %898 = vmatpush1.bf16.msra.mxu1 %v1354_v8  ;;  %v1451_v7 = vld [vmem:[#allocation5 + $0x3f4] ss:$8 sps:$4 sm:$0xff]   ;;  %v1446_v8 = vld [vmem:[#allocation5 + $0x1f0] ss:$8 sps:$4 sm:$0xff]  }
  0x6a   :  { %980 = vmatpush1.bf16.msra.mxu0 %v1359_v9  ;;  %899 = vmatprep.subr.bf16.mxu1 %v1364_v10  ;;  %v1449_v9 = vld [vmem:[#allocation5 + $0x3f0] ss:$8 sps:$4 sm:$0xff]   ;;  %v1104_v10 = vcombine.low %v1614_v32, %v1614_v32 }
  0x6b   :  { %981 = vmatprep.subr.bf16.mxu0 %v1367_v11  ;;  %929 = vmatprep.mubr.bf16.mxu1 %v1105_v34  ;;  %v1108_v11 = vcombine.low %v1616_v33, %v1616_v33 }
  0x6c   :  { %1011 = vmatprep.mubr.bf16.mxu0 %v1109_v35 }
  0x6d   :  { %900 = vmatpush1.bf16.msra.mxu1 %v1362_v12  ;;  %v178_v12 = vlaneseq }
  0x6e   :  { %982 = vmatpush1.bf16.msra.mxu0 %v1365_v13  ;;  %901 = vmatprep.subr.bf16.mxu1 %v1370_v14 }
  0x6f   :  { %983 = vmatprep.subr.bf16.mxu0 %v1373_v15  ;;  %v1626_v13 = vshrl.u32 %v178_v12, 7  ;;  %v176_v15 = vld [vmem:[%s1662_s2] sm:$0x3]  ;;  %s1500_s2 = scalar_lea.vmem %s1079_s16, 256 }
  0x70   :  { %p1501_p2 = scmp.ne.s32.totalorder %s1079_s16, %s1500_s2  ;;  %p1506_p4 = scmp.lt.s32.totalorder %s1500_s2, %s1500_s2 }
  0x71   :  { %902 = vmatpush1.bf16.msra.mxu1 %v1368_v16  ;;  %v180_v14 = vsub.s32 0, %v1626_v13  ;;  %v184_v16 = vsub.s32 1, %v1626_v13  ;;  %vm1027_vm0 = vcmp.lt.s32.totalorder %v1626_v13, 4 }
  0x72   :  { %984 = vmatpush1.bf16.msra.mxu0 %v1371_v17  ;;  %903 = vmatprep.subr.bf16.mxu1 %v1376_v18  ;;  %p1507_p5 = por %p1506_p4, %p1505_p3 }
  0x73   :  { %985 = vmatprep.subr.bf16.mxu0 %v1379_v19  ;;  %v181_v17 = vrot.slane %v176_v15, %v180_v14  ;;  %v185_v18 = vrot.slane %v176_v15, %v184_v16 }
  0x74   :  { %p1508_p6 = pnand %p1507_p5, %p1501_p2 }
  0x75   :  { %904 = vmatpush1.bf16.msra.mxu1 %v1374_v20 }
  0x76   :  { %986 = vmatpush1.bf16.msra.mxu0 %v1377_v21  ;;  %905 = vmatprep.subr.bf16.mxu1 %v1382_v22 }
  0x77   :  { %987 = vmatprep.subr.bf16.mxu0 %v1385_v23 }
  0x79   :  { %906 = vmatpush1.bf16.msra.mxu1 %v1380_v24 }
  0x7a   :  { %988 = vmatpush1.bf16.msra.mxu0 %v1383_v25  ;;  %907 = vmatprep.subr.bf16.mxu1 %v1388_v26 }
  0x7b   :  { %989 = vmatprep.subr.bf16.mxu0 %v1391_v27 }
  0x7d   :  { %908 = vmatpush1.bf16.msra.mxu1 %v1386_v28 }
  0x7e   :  { %990 = vmatpush1.bf16.msra.mxu0 %v1389_v29  ;;  %909 = vmatprep.subr.bf16.mxu1 %v1394_v30 }
  0x7f   :  { %991 = vmatprep.subr.bf16.mxu0 %v1397_v31 }
  0x81   :  { %910 = vmatpush1.bf16.msra.mxu1 %v1392_v36 }
  0x82   :  { %992 = vmatpush1.bf16.msra.mxu0 %v1395_v37  ;;  %911 = vmatprep.subr.bf16.mxu1 %v1400_v38 }
  0x83   :  { %993 = vmatprep.subr.bf16.mxu0 %v1403_v39 }
  0x85   :  { %912 = vmatpush1.bf16.msra.mxu1 %v1398_v40 }
  0x86   :  { %994 = vmatpush1.bf16.msra.mxu0 %v1401_v41  ;;  %913 = vmatprep.subr.bf16.mxu1 %v1406_v42 }
  0x87   :  { %995 = vmatprep.subr.bf16.mxu0 %v1409_v43 }
  0x89   :  { %914 = vmatpush1.bf16.msra.mxu1 %v1404_v44 }
  0x8a   :  { %996 = vmatpush1.bf16.msra.mxu0 %v1407_v45  ;;  %915 = vmatprep.subr.bf16.mxu1 %v1412_v46 }
  0x8b   :  { %997 = vmatprep.subr.bf16.mxu0 %v1415_v47 }
  0x8d   :  { %916 = vmatpush1.bf16.msra.mxu1 %v1410_v48 }
  0x8e   :  { %998 = vmatpush1.bf16.msra.mxu0 %v1413_v49  ;;  %917 = vmatprep.subr.bf16.mxu1 %v1418_v50 }
  0x8f   :  { %999 = vmatprep.subr.bf16.mxu0 %v1421_v51 }
  0x91   :  { %918 = vmatpush1.bf16.msra.mxu1 %v1416_v52 }
  0x92   :  { %1000 = vmatpush1.bf16.msra.mxu0 %v1419_v53  ;;  %919 = vmatprep.subr.bf16.mxu1 %v1424_v54 }
  0x93   :  { %1001 = vmatprep.subr.bf16.mxu0 %v1427_v55 }
  0x95   :  { %920 = vmatpush1.bf16.msra.mxu1 %v1422_v56 }
  0x96   :  { %1002 = vmatpush1.bf16.msra.mxu0 %v1425_v57  ;;  %921 = vmatprep.subr.bf16.mxu1 %v1430_v58 }
  0x97   :  { %1003 = vmatprep.subr.bf16.mxu0 %v1433_v59 }
  0x99   :  { %922 = vmatpush1.bf16.msra.mxu1 %v1428_v60 }
  0x9a   :  { %1004 = vmatpush1.bf16.msra.mxu0 %v1431_v61  ;;  %923 = vmatprep.subr.bf16.mxu1 %v1436_v62 }
  0x9b   :  { %1005 = vmatprep.subr.bf16.mxu0 %v1439_v63 }
  0x9d   :  { %924 = vmatpush1.bf16.msra.mxu1 %v1434_v0 }
  0x9e   :  { %1006 = vmatpush1.bf16.msra.mxu0 %v1437_v1  ;;  %925 = vmatprep.subr.bf16.mxu1 %v1442_v2 }
  0x9f   :  { %1007 = vmatprep.subr.bf16.mxu0 %v1445_v3 }
  0xa1   :  { %926 = vmatpush1.bf16.msra.mxu1 %v1440_v4 }
  0xa2   :  { %1008 = vmatpush1.bf16.msra.mxu0 %v1443_v5  ;;  %927 = vmatprep.subr.bf16.mxu1 %v1448_v6 }
  0xa3   :  { %1009 = vmatprep.subr.bf16.mxu0 %v1451_v7 }
  0xa5   :  { %928 = vmatpush1.bf16.msra.mxu1 %v1446_v8 }
  0xa6   :  { %1010 = vmatpush1.bf16.msra.mxu0 %v1449_v9 }
  0xa8   :  { %930 = vmatmul.mubr.bf16.vlgmr.msra.gmra.mrb[0].mxu1 %v1104_v10 }
  0xa9   :  { %1012 = vmatmul.mubr.bf16.vlgmr.msra.gmra.mrb[0].mxu0 %v1108_v11 }
 0x17b   :  { %v931_v19 = vpop.f32.mrb[0].mxu1 }
 0x17c   :  { %v1013_v20 = vpop.f32.mrb[0].mxu0  ;;  %v1238_v21 = vadd.f32 %v931_v19, %v181_v17  ;;  %v933_v22 = vpop.f32.mrb[1].mxu1 }
 0x17d   :  { %v1015_v23 = vpop.f32.mrb[1].mxu0  ;;  %v1240_v24 = vadd.f32 %v933_v22, %v185_v18  ;;  %v935_v25 = vpop.f32.mrb[2].mxu1 }
 0x17e   :  { %v1017_v26 = vpop.f32.mrb[2].mxu0  ;;  %v1239_v27 = vadd.f32 %v1238_v21, %v1013_v20  ;;  %v936_v28 = vpop.f32.mrb[3].mxu1 }
 0x17f   :  { %v1018_v29 = vpop.f32.mrb[3].mxu0  ;;  %v1241_v30 = vadd.f32 %v1240_v24, %v1015_v23 }
 0x180   :  { %1020 = vst [vmem:[#allocation7] sm:$0xff] %v1239_v27  ;;  %v1030_v31 = vsel %vm1027_vm0, %v1239_v27, 0.0 }
 0x181   :  { %v1032_v32 = vrot.slane %v1030_v31, 4  ;;  %v1044_v33 = vmul.f32 %v1030_v31, %v1030_v31  ;;  %1021 = vst [vmem:[#allocation7 + $0x8] sm:$0xff] %v1241_v30  ;;  %v1031_v34 = vsel %vm1027_vm0, %v1241_v30, 0.0 }
 0x182   :  { %v1038_v35 = vrot.slane %v1031_v34, 4  ;;  %v1045_v36 = vmul.f32 %v1031_v34, %v1031_v34 }
 0x183   :  { %1511 = shalt.err (!%p1508_p6)
}
 0x184   :  { %s1512_s19 = scalar_lea.hbm %s1663_s3, 256 }
 0x185   :  { %p1513_p7 = scmp.ne.s32.totalorder %s1663_s3, %s1512_s19  ;;  %p1516_p8 = scmp.lt.u32.totalorder %s1512_s19, %s1663_s3 }
 0x187   :  { %p1518_p9 = pnand %p1516_p8, %p1513_p7 }
 0x189   :  { %1521 = shalt.err (!%p1518_p9)
}
 0x18a   :  { %1081 = dma.vmem_to_hbm [thread:$0]  %s1079_s16, 256, %s1663_s3, [#allocation4]   ;;  %v1033_v37 = vadd.f32 %v1032_v32, %v1030_v31  ;;  %v1046_v38 = vrot.slane %v1044_v33, 4  ;;  %v1039_v39 = vadd.f32 %v1038_v35, %v1031_v34  ;;  %v1052_v40 = vrot.slane %v1045_v36, 4 }
 0x18b   :  { %vm1058_vm1 = vcmp.eq.s32.totalorder %v1626_v13, 0  ;;  %vm1063_vm2 = vcmp.eq.s32.totalorder %v1626_v13, 1  ;;  %s1557_s3 = smov [#allocation8]  }
 0x18c   :  { %v1034_v41 = vrot.slane %v1033_v37, 2  ;;  %v1047_v42 = vadd.f32 %v1046_v38, %v1044_v33  ;;  %v1040_v43 = vrot.slane %v1039_v39, 2  ;;  %v1053_v44 = vadd.f32 %v1052_v40, %v1045_v36  ;;  %s1088_s26 = sshll.u32 %s1557_s3, 4  ;;  %s1089_s26 = int_to_ptr.vmem [resolvable:$true] %s1088_s26 }
 0x18d   :  { %s1522_s27 = scalar_lea.vmem %s1089_s26, 256  ;;  %p1527_p11 = scmp.lt.s32.totalorder %s1089_s26, %s1089_s26 }
 0x18e   :  { %v1035_v45 = vadd.f32 %v1034_v41, %v1033_v37  ;;  %v1048_v46 = vrot.slane %v1047_v42, 2  ;;  %v1041_v47 = vadd.f32 %v1040_v43, %v1039_v39  ;;  %v1054_v48 = vrot.slane %v1053_v44, 2  ;;  %p1523_p10 = scmp.ne.s32.totalorder %s1089_s26, %s1522_s27  ;;  %p1528_p12 = scmp.lt.s32.totalorder %s1522_s27, %s1522_s27 }
 0x190   :  { %v1036_v49 = vrot.slane %v1035_v45, 1  ;;  %v1049_v50 = vadd.f32 %v1048_v46, %v1047_v42  ;;  %v1042_v51 = vrot.slane %v1041_v47, 1  ;;  %v1055_v52 = vadd.f32 %v1054_v48, %v1053_v44  ;;  %p1529_p13 = por %p1528_p12, %p1527_p11 }
 0x192   :  { %v1037_v53 = vadd.f32 %v1036_v49, %v1035_v45  ;;  %v1050_v54 = vrot.slane %v1049_v50, 1  ;;  %v1043_v55 = vadd.f32 %v1042_v51, %v1041_v47  ;;  %v1056_v56 = vrot.slane %v1055_v52, 1  ;;  %p1530_p0 = pnand %p1529_p13, %p1523_p10 }
 0x194   :  { %v1051_v57 = vadd.f32 %v1050_v54, %v1049_v50  ;;  %v1057_v58 = vadd.f32 %v1056_v56, %v1055_v52  ;;  %v1061_v59 = vsel %vm1058_vm1, %v1037_v53, 0.0  ;;  %v1062_v61 = vsel %vm1058_vm1, %v1043_v55, 0.0 }
 0x196   :  { %v1066_v60 = vsel %vm1063_vm2, %v1051_v57, 0.0  ;;  %v1067_v62 = vsel %vm1063_vm2, %v1057_v58, 0.0 }
 0x197   :  { %v1068_v63 = vadd.f32 %v1066_v60, %v1061_v59  ;;  %v1069_v0 = vadd.f32 %v1067_v62, %v1062_v61 }
 0x199   :  { %1070 = vst [vmem:[#allocation8] sm:$0xff] %v1068_v63  ;;  %1071 = vst [vmem:[#allocation8 + $0x8] sm:$0xff] %v1069_v0 }
 0x19a   :  { %1533 = shalt.err (!%p1530_p0)
}
 0x19b   :  { %s1534_s30 = scalar_lea.hbm %s1664_s4, 256 }
 0x19c   :  { %p1535_p1 = scmp.ne.s32.totalorder %s1664_s4, %s1534_s30  ;;  %p1538_p2 = scmp.lt.u32.totalorder %s1534_s30, %s1664_s4 }
 0x19e   :  { %p1540_p3 = pnand %p1538_p2, %p1535_p1 }
 0x1a0   :  { %1543 = shalt.err (!%p1540_p3)
}
 0x1a1   :  { %1091 = dma.vmem_to_hbm [thread:$0]  %s1089_s26, 256, %s1664_s4, [#allocation9]  }
 0x1a2   :  { %1548 = dma.done.wait [#allocation4], 256  }
 0x1a3   :  { %1549 = vsyncadd [#allocation4], 4294967040 }
 0x1a4   :  { %1550 = dma.done.wait [#allocation9], 256  }
 0x1a5   :  { %1551 = vsyncadd [#allocation9], 4294967040 }
 0x1a6   :  { %1098 = vsyncpa [#allocation3], 1 }
 0x1a7   :  { %1099 = vsyncpa [#allocation6], 1 }
 0x1a8   :  { %1100 = vsyncpa [#allocation4], 1 }
 0x1a9   :  { %1101 = vsyncpa [#allocation9], 1 }

</bundles_post_ra>
